<compile_context>
chip_gen: v7x
topology: tpu7x:2x2x1
jax: 0.10.0
libtpu: 0.0.40
codegen_flags: <defaults>
</compile_context>

<pallas_src>
import jax
import jax.numpy as jnp
from jax import lax
from jax.experimental import pallas as pl
from jax.experimental.pallas import tpu as pltpu


def _round_up(n, m):
    return ((n + m - 1) // m) * m


# --------------------------------------------------------------------------
# Fused kernel: ChebyNet (collapsed) + LeakyReLU + LSTM + classifier
# --------------------------------------------------------------------------
def fused_dgcnn_lstm_kernel(x_ref, mbig_ref, wih_ref, whh_ref, b_ref,
                            wcls_ref, bcls_ref, o_ref, xproj_ref):
    # x_ref    : [L, TB, dCp]  time-major batch tile, features zero-padded to 128
    # mbig_ref : [dCp, dOp]    block-diag collapsed ChebyNet matrix (bf16 or f32)
    # wih_ref  : [dOp, 4H]     LSTM W_ih^T, rows zero-padded (same dtype as mbig)
    # whh_ref  : [H, 4H]       LSTM W_hh^T (f32)
    # b_ref    : [1, 4H]       b_ih + b_hh
    # wcls_ref : [H, NCP]      classifier W^T, zero-padded to 128 lanes
    # bcls_ref : [1, NCP]
    # o_ref    : [TB, NCP]     lane-dense padded logits
    # xproj_ref: [L*TB, 4H]    VMEM staging of the hoisted LSTM input projection
    L, TB, DCp = x_ref.shape
    H = whh_ref.shape[0]
    G = whh_ref.shape[1]            # 4H
    mm_dtype = mbig_ref.dtype       # bf16 (v6e/v7x) or f32 feed-forward matmuls

    # ---- ChebyNet: all K graph convolutions collapsed into one MXU matmul ----
    xf = x_ref[...].reshape(L * TB, DCp)     # copy-free sublane collapse when TB % 8 == 0
    g = jnp.dot(xf.astype(mm_dtype), mbig_ref[...],
                preferred_element_type=jnp.float32)             # [L*TB, dOp]
    seq = jnp.where(g >= 0.0, g, 0.01 * g)                      # LeakyReLU (slope 0.01)

    # ---- hoisted LSTM input projection, staged in explicit VMEM scratch ----
    xproj_ref[...] = jnp.dot(seq.astype(mm_dtype), wih_ref[...],
                             preferred_element_type=jnp.float32) + b_ref[...]

    # ---- fully unrolled LSTM recurrence (PyTorch gate order i, f, g, o) ----
    whh = whh_ref[...]
    lane = lax.broadcasted_iota(jnp.int32, (TB, G), 1)
    is_g = jnp.logical_and(lane >= 2 * H, lane < 3 * H)         # lanes holding g-gate

    h = jnp.zeros((TB, H), jnp.float32)
    c = jnp.zeros((TB, H), jnp.float32)
    for t in range(L):  # L small & static -> full unroll, all slices static
        gates = xproj_ref[pl.ds(t * TB, TB), :] + jnp.dot(
            h, whh, preferred_element_type=jnp.float32)
        # Single tanh pass: sigmoid(x) = 0.5 * tanh(x / 2) + 0.5
        z = jnp.where(is_g, gates, 0.5 * gates)
        th = jnp.tanh(z)
        act = jnp.where(is_g, th, 0.5 * th + 0.5)
        i_g = act[:, 0:H]
        f_g = act[:, H:2 * H]
        g_g = act[:, 2 * H:3 * H]
        o_g = act[:, 3 * H:4 * H]
        c = f_g * c + i_g * g_g
        h = o_g * jnp.tanh(c)

    # ---- classifier on the last hidden state (lane-dense 128-wide store) ----
    logits = jnp.dot(h, wcls_ref[...], preferred_element_type=jnp.float32) + bcls_ref[...]
    o_ref[...] = logits.astype(o_ref.dtype)


# --------------------------------------------------------------------------
# Parameter-only preprocessing (plain JAX; tiny C x C math, once per call)
# --------------------------------------------------------------------------
def build_combined_cheb_matrix(W, Wg, d):
    """Collapse normalize_A + Chebyshev polynomials + K graph-conv weights into
    one block-diagonal matrix  Mbig = kron(I_d, sum_k P_k^T Wg_k^T)."""
    K, O, C = Wg.shape
    A = jnp.maximum(W, 0.0)
    deg = jnp.sum(A, axis=1)
    dinv = lax.rsqrt(deg + 1e-10)
    Lap = dinv[:, None] * A * dinv[None, :]                    # D^{-1/2} A D^{-1/2}

    M = jnp.zeros((C, O), jnp.float32)
    P = jnp.eye(C, dtype=jnp.float32)
    for k in range(K):
        if k == 1:
            P = Lap
        elif k >= 2:
            P = P @ Lap
        M = M + P.T @ Wg[k].T
    return jnp.kron(jnp.eye(d, dtype=jnp.float32), M)          # [d*C, d*O]


def _pick_batch_tile(bs, max_tile=128):
    """Divisor of bs, multiple of 8 when possible; guarantee >= 2 grid steps for
    bs >= 16 so both v7x TensorCores get work.  Sweep max_tile in {64,128,256}."""
    if bs < 16 or bs % 8 != 0:
        return bs
    cap = max(8, (min(max_tile, bs // 2) // 8) * 8)
    for tb in range(cap, 7, -8):
        if bs % tb == 0:
            return tb
    return bs


# --------------------------------------------------------------------------
# Wrapper: padding / layout plumbing + pallas_call
# --------------------------------------------------------------------------
def dgcnn_lstm_forward(x, params, batch_tile=128, use_bf16_matmul=True):
    bs, L, d, C = x.shape
    K, O, _ = params["Wg"].shape
    H = params["hidden"]
    ncls = params["W_cls"].shape[0]

    dC, dO = d * C, d * O
    dCp, dOp = _round_up(dC, 128), _round_up(dO, 128)
    NCP = _round_up(ncls, 128)
    G = 4 * H
    mm_dtype = jnp.bfloat16 if use_bf16_matmul else jnp.float32

    # Parameter-only preprocessing.
    mbig = build_combined_cheb_matrix(params["W"], params["Wg"], d)            # [dC, dO]
    mbig_p = jnp.zeros((dCp, dOp), jnp.float32).at[:dC, :dO].set(mbig).astype(mm_dtype)
    wih_p = jnp.zeros((dOp, G), jnp.float32).at[:dO, :].set(
        params["W_ih"].T.astype(jnp.float32)).astype(mm_dtype)
    whh_t = params["W_hh"].T.astype(jnp.float32)                               # [H, 4H]
    bias = (params["b_ih"] + params["b_hh"])[None, :].astype(jnp.float32)      # [1, 4H]
    wcls_p = jnp.zeros((H, NCP), jnp.float32).at[:, :ncls].set(params["W_cls"].T)
    bcls_p = jnp.zeros((1, NCP), jnp.float32).at[:, :ncls].set(params["b_cls"][None, :])

    # Layout plumbing: time-major (L, bs, d*C), features zero-padded to 128 lanes.
    x_tm = jnp.transpose(x.astype(jnp.float32), (1, 0, 2, 3)).reshape(L, bs, dC)
    x_tm = jnp.pad(x_tm, ((0, 0), (0, 0), (0, dCp - dC)))

    TB = _pick_batch_tile(bs, batch_tile)
    grid = (bs // TB,)

    wbytes = 2 if use_bf16_matmul else 4
    cost = pl.CostEstimate(
        flops=2 * bs * L * (dCp * dOp + dOp * G + H * G) + 2 * bs * H * NCP,
        transcendentals=bs * L * (G + H),
        bytes_accessed=(bs * L * dCp * 4 + bs * NCP * 4
                        + (dCp * dOp + dOp * G) * wbytes
                        + (H * G + G + H * NCP + NCP) * 4),
    )

    out = pl.pallas_call(
        fused_dgcnn_lstm_kernel,
        out_shape=jax.ShapeDtypeStruct((bs, NCP), jnp.float32),
        grid=grid,
        in_specs=[
            pl.BlockSpec((L, TB, dCp), lambda i: (0, i, 0)),   # batch-tiled input
            pl.BlockSpec((dCp, dOp), lambda i: (0, 0)),        # broadcast weights
            pl.BlockSpec((dOp, G), lambda i: (0, 0)),
            pl.BlockSpec((H, G), lambda i: (0, 0)),
            pl.BlockSpec((1, G), lambda i: (0, 0)),
            pl.BlockSpec((H, NCP), lambda i: (0, 0)),
            pl.BlockSpec((1, NCP), lambda i: (0, 0)),
        ],
        out_specs=pl.BlockSpec((TB, NCP), lambda i: (i, 0)),
        scratch_shapes=[pltpu.VMEM((L * TB, G), jnp.float32)],   # xproj staging
        compiler_params=pltpu.CompilerParams(
            dimension_semantics=("parallel",),
            vmem_limit_bytes=32 * 1024 * 1024,
        ),
        cost_estimate=cost,
    )(x_tm, mbig_p, wih_p, whh_t, bias, wcls_p, bcls_p)

    return out[:, :ncls]


# --------------------------------------------------------------------------
# Pure-JAX reference (mirrors the PyTorch forward) for a sanity check
# --------------------------------------------------------------------------
def reference_forward(x, params):
    W, Wg = params["W"], params["Wg"]
    K, O, C = Wg.shape
    H = params["hidden"]

    A = jnp.maximum(W, 0.0)
    deg = jnp.sum(A, axis=1)
    dinv = 1.0 / jnp.sqrt(deg + 1e-10)
    D = jnp.diag(dinv)
    Lap = D @ A @ D

    supports = []
    for i in range(K):
        if i == 0:
            supports.append(jnp.eye(C, dtype=jnp.float32))
        elif i == 1:
            supports.append(Lap)
        else:
            supports.append(supports[-1] @ Lap)

    res = None
    for i in range(K):
        t = jnp.einsum("blwc,kc->blwk", x, supports[i])
        t = jnp.einsum("blwc,oc->blwo", t, Wg[i])
        res = t if res is None else res + t
    res = jnp.where(res >= 0.0, res, 0.01 * res)

    bs, Lwin, d, _ = x.shape
    seq = res.reshape(bs, Lwin, d * O)

    wih_t, whh_t = params["W_ih"].T, params["W_hh"].T
    b = params["b_ih"] + params["b_hh"]
    h = jnp.zeros((bs, H), jnp.float32)
    c = jnp.zeros((bs, H), jnp.float32)
    for t in range(Lwin):
        gates = seq[:, t] @ wih_t + h @ whh_t + b
        i_g = jax.nn.sigmoid(gates[:, 0:H])
        f_g = jax.nn.sigmoid(gates[:, H:2 * H])
        g_g = jnp.tanh(gates[:, 2 * H:3 * H])
        o_g = jax.nn.sigmoid(gates[:, 3 * H:4 * H])
        c = f_g * c + i_g * g_g
        h = o_g * jnp.tanh(c)
    return h @ params["W_cls"].T + params["b_cls"]


# --------------------------------------------------------------------------
# Deterministic parameter construction + demo run
# --------------------------------------------------------------------------
def make_params(key, in_chan, K, out_chan, d, num_cls, hidden):
    ks = jax.random.split(key, 8)
    din = d * out_chan
    xavier_std = (2.0 / (in_chan + in_chan)) ** 0.5
    lstm_b = 1.0 / (hidden ** 0.5)
    lin_b = 1.0 / (in_chan ** 0.5)
    cls_b = 1.0 / (hidden ** 0.5)
    return {
        "W": xavier_std * jax.random.normal(ks[0], (in_chan, in_chan), jnp.float32),
        "Wg": jax.random.uniform(ks[1], (K, out_chan, in_chan), jnp.float32, -lin_b, lin_b),
        "W_ih": jax.random.uniform(ks[2], (4 * hidden, din), jnp.float32, -lstm_b, lstm_b),
        "W_hh": jax.random.uniform(ks[3], (4 * hidden, hidden), jnp.float32, -lstm_b, lstm_b),
        "b_ih": jax.random.uniform(ks[4], (4 * hidden,), jnp.float32, -lstm_b, lstm_b),
        "b_hh": jax.random.uniform(ks[5], (4 * hidden,), jnp.float32, -lstm_b, lstm_b),
        "W_cls": jax.random.uniform(ks[6], (num_cls, hidden), jnp.float32, -cls_b, cls_b),
        "b_cls": jax.random.uniform(ks[7], (num_cls,), jnp.float32, -cls_b, cls_b),
        "hidden": hidden,
    }


if __name__ == "__main__":
    # Small shapes consistent with the module: x = [bs, L, d, num_chans]
    bs, Lwin, d, in_chan = 2, 8, 4, 16
    K, out_chan, hidden, num_cls = 3, 16, 32, 2

    key = jax.random.PRNGKey(0)
    kx, kp = jax.random.split(key)
    x = jax.random.normal(kx, (bs, Lwin, d, in_chan), jnp.float32)
    params = make_params(kp, in_chan, K, out_chan, d, num_cls, hidden)

    ref = jax.block_until_ready(reference_forward(x, params))

    # f32 feed-forward path: tight tolerance (exactness check of the fused kernel)
    logits_f32 = jax.block_until_ready(
        dgcnn_lstm_forward(x, params, use_bf16_matmul=False))
    assert logits_f32.shape == (bs, num_cls)
    assert jnp.allclose(logits_f32, ref, rtol=2e-3, atol=2e-3), (logits_f32, ref)

    # bf16 feed-forward matmuls (default fast path): relaxed tolerance for bf16 drift
    logits_bf16 = jax.block_until_ready(
        dgcnn_lstm_forward(x, params, use_bf16_matmul=True))
    assert logits_bf16.shape == (bs, num_cls)
    assert jnp.allclose(logits_bf16, ref, rtol=3e-2, atol=3e-2), (logits_bf16, ref)

    print("KERNEL_OK")
</pallas_src>

<mosaic_0001>
module attributes {stable_mosaic.version = 11 : i64} {
  func.func @fused_dgcnn_lstm_kernel(%arg0: i32, %arg1: memref<8x2x128xf32, #tpu.memory_space<vmem>>, %arg2: memref<128x128xf32, #tpu.memory_space<vmem>>, %arg3: memref<128x128xf32, #tpu.memory_space<vmem>>, %arg4: memref<32x128xf32, #tpu.memory_space<vmem>>, %arg5: memref<1x128xf32, #tpu.memory_space<vmem>>, %arg6: memref<32x128xf32, #tpu.memory_space<vmem>>, %arg7: memref<1x128xf32, #tpu.memory_space<vmem>>, %arg8: memref<2x128xf32, #tpu.memory_space<vmem>>, %arg9: memref<16x128xf32, #tpu.memory_space<vmem>>) attributes {dimension_semantics = [#tpu.dimension_semantics<parallel>], iteration_bounds = array<i64: 1>, scalar_prefetch = 0 : i64, scratch_operands = 1 : i64, tpu.core_type = #tpu.core_type<tc>, window_params = [{transform_indices = @transform_0, window_bounds = array<i64: 8, 2, 128>}, {pipeline_mode = #tpu.pipeline_mode<synchronous>, transform_indices = @transform_1, window_bounds = array<i64: 128, 128>}, {pipeline_mode = #tpu.pipeline_mode<synchronous>, transform_indices = @transform_2, window_bounds = array<i64: 128, 128>}, {pipeline_mode = #tpu.pipeline_mode<synchronous>, transform_indices = @transform_3, window_bounds = array<i64: 32, 128>}, {pipeline_mode = #tpu.pipeline_mode<synchronous>, transform_indices = @transform_4, window_bounds = array<i64: 1, 128>}, {pipeline_mode = #tpu.pipeline_mode<synchronous>, transform_indices = @transform_5, window_bounds = array<i64: 32, 128>}, {pipeline_mode = #tpu.pipeline_mode<synchronous>, transform_indices = @transform_6, window_bounds = array<i64: 1, 128>}, {transform_indices = @transform_7, window_bounds = array<i64: 2, 128>}]} {
    %c0 = arith.constant 0 : index
    %c0_0 = arith.constant 0 : index
    %c0_1 = arith.constant 0 : index
    %0 = vector.load %arg1[%c0, %c0_0, %c0_1] : memref<8x2x128xf32, #tpu.memory_space<vmem>>, vector<8x2x128xf32>
    %1 = vector.shape_cast %0 : vector<8x2x128xf32> to vector<16x128xf32>
    %c0_2 = arith.constant 0 : index
    %c0_3 = arith.constant 0 : index
    %2 = vector.load %arg2[%c0_2, %c0_3] : memref<128x128xf32, #tpu.memory_space<vmem>>, vector<128x128xf32>
    %cst = arith.constant dense<0.000000e+00> : vector<16x128xf32>
    %3 = tpu.matmul %1, %2, %cst {dimension_numbers = #tpu.dot_dimension_numbers<[1], [0], [0], [1], [0, 0, 1, 1], [], []>} : vector<16x128xf32>, vector<128x128xf32>, vector<16x128xf32> -> vector<16x128xf32>
    %cst_4 = arith.constant 0.000000e+00 : f32
    %4 = vector.broadcast %cst_4 : f32 to vector<16x128xf32>
    %5 = arith.cmpf oge, %3, %4 : vector<16x128xf32>
    %cst_5 = arith.constant 0.00999999977 : f32
    %6 = vector.broadcast %cst_5 : f32 to vector<16x128xf32>
    %7 = arith.mulf %6, %3 : vector<16x128xf32>
    %8 = arith.select %5, %3, %7 : vector<16x128xi1>, vector<16x128xf32>
    %c0_6 = arith.constant 0 : index
    %c0_7 = arith.constant 0 : index
    %9 = vector.load %arg3[%c0_6, %c0_7] : memref<128x128xf32, #tpu.memory_space<vmem>>, vector<128x128xf32>
    %cst_8 = arith.constant dense<0.000000e+00> : vector<16x128xf32>
    %10 = tpu.matmul %8, %9, %cst_8 {dimension_numbers = #tpu.dot_dimension_numbers<[1], [0], [0], [1], [0, 0, 1, 1], [], []>} : vector<16x128xf32>, vector<128x128xf32>, vector<16x128xf32> -> vector<16x128xf32>
    %c0_9 = arith.constant 0 : index
    %c0_10 = arith.constant 0 : index
    %11 = vector.load %arg5[%c0_9, %c0_10] : memref<1x128xf32, #tpu.memory_space<vmem>>, vector<1x128xf32>
    %12 = vector.broadcast %11 : vector<1x128xf32> to vector<16x128xf32>
    %13 = arith.addf %10, %12 : vector<16x128xf32>
    %c0_11 = arith.constant 0 : index
    %c0_12 = arith.constant 0 : index
    %14 = vector.load %arg9[%c0_11, %c0_12] : memref<16x128xf32, #tpu.memory_space<vmem>>, vector<16x128xf32>
    tpu.vector_store %arg9[%c0_11, %c0_12], %13 {strides = array<i32>} : memref<16x128xf32, #tpu.memory_space<vmem>>, vector<16x128xf32>,
    %c0_13 = arith.constant 0 : index
    %c0_14 = arith.constant 0 : index
    %15 = vector.load %arg4[%c0_13, %c0_14] : memref<32x128xf32, #tpu.memory_space<vmem>>, vector<32x128xf32>
    %16 = tpu.iota {dimensions = array<i32: 1>} : vector<2x128xi32>
    %c64_i32 = arith.constant 64 : i32
    %17 = vector.broadcast %c64_i32 : i32 to vector<2x128xi32>
    %18 = arith.cmpi sge, %16, %17 : vector<2x128xi32>
    %c96_i32 = arith.constant 96 : i32
    %19 = vector.broadcast %c96_i32 : i32 to vector<2x128xi32>
    %20 = arith.cmpi slt, %16, %19 : vector<2x128xi32>
    %21 = arith.andi %18, %20 : vector<2x128xi1>
    %cst_15 = arith.constant 0.000000e+00 : f32
    %22 = vector.broadcast %cst_15 : f32 to vector<2x32xf32>
    %cst_16 = arith.constant 0.000000e+00 : f32
    %23 = vector.broadcast %cst_16 : f32 to vector<2x32xf32>
    %c0_17 = arith.constant 0 : index
    %c0_18 = arith.constant 0 : index
    %24 = vector.load %arg9[%c0_17, %c0_18] : memref<16x128xf32, #tpu.memory_space<vmem>>, vector<2x128xf32>
    %cst_19 = arith.constant dense<0.000000e+00> : vector<2x128xf32>
    %25 = tpu.matmul %22, %15, %cst_19 {dimension_numbers = #tpu.dot_dimension_numbers<[1], [0], [0], [1], [0, 0, 1, 1], [], []>} : vector<2x32xf32>, vector<32x128xf32>, vector<2x128xf32> -> vector<2x128xf32>
    %26 = arith.addf %24, %25 : vector<2x128xf32>
    %cst_20 = arith.constant 5.000000e-01 : f32
    %27 = vector.broadcast %cst_20 : f32 to vector<2x128xf32>
    %28 = arith.mulf %27, %26 : vector<2x128xf32>
    %29 = arith.select %21, %26, %28 : vector<2x128xi1>, vector<2x128xf32>
    %30 = math.tanh %29 : vector<2x128xf32>
    %cst_21 = arith.constant 5.000000e-01 : f32
    %31 = vector.broadcast %cst_21 : f32 to vector<2x128xf32>
    %32 = arith.mulf %31, %30 : vector<2x128xf32>
    %cst_22 = arith.constant 5.000000e-01 : f32
    %33 = vector.broadcast %cst_22 : f32 to vector<2x128xf32>
    %34 = arith.addf %32, %33 : vector<2x128xf32>
    %35 = arith.select %21, %30, %34 : vector<2x128xi1>, vector<2x128xf32>
    %36 = vector.extract_strided_slice %35 {offsets = [0, 0], sizes = [2, 32], strides = [1, 1]} : vector<2x128xf32> to vector<2x32xf32>
    %37 = vector.extract_strided_slice %35 {offsets = [0, 32], sizes = [2, 32], strides = [1, 1]} : vector<2x128xf32> to vector<2x32xf32>
    %38 = vector.extract_strided_slice %35 {offsets = [0, 64], sizes = [2, 32], strides = [1, 1]} : vector<2x128xf32> to vector<2x32xf32>
    %39 = vector.extract_strided_slice %35 {offsets = [0, 96], sizes = [2, 32], strides = [1, 1]} : vector<2x128xf32> to vector<2x32xf32>
    %40 = arith.mulf %37, %23 : vector<2x32xf32>
    %41 = arith.mulf %36, %38 : vector<2x32xf32>
    %42 = arith.addf %40, %41 : vector<2x32xf32>
    %43 = math.tanh %42 : vector<2x32xf32>
    %44 = arith.mulf %39, %43 : vector<2x32xf32>
    %c2 = arith.constant 2 : index
    %c0_23 = arith.constant 0 : index
    %45 = vector.load %arg9[%c2, %c0_23] : memref<16x128xf32, #tpu.memory_space<vmem>>, vector<2x128xf32>
    %cst_24 = arith.constant dense<0.000000e+00> : vector<2x128xf32>
    %46 = tpu.matmul %44, %15, %cst_24 {dimension_numbers = #tpu.dot_dimension_numbers<[1], [0], [0], [1], [0, 0, 1, 1], [], []>} : vector<2x32xf32>, vector<32x128xf32>, vector<2x128xf32> -> vector<2x128xf32>
    %47 = arith.addf %45, %46 : vector<2x128xf32>
    %cst_25 = arith.constant 5.000000e-01 : f32
    %48 = vector.broadcast %cst_25 : f32 to vector<2x128xf32>
    %49 = arith.mulf %48, %47 : vector<2x128xf32>
    %50 = arith.select %21, %47, %49 : vector<2x128xi1>, vector<2x128xf32>
    %51 = math.tanh %50 : vector<2x128xf32>
    %cst_26 = arith.constant 5.000000e-01 : f32
    %52 = vector.broadcast %cst_26 : f32 to vector<2x128xf32>
    %53 = arith.mulf %52, %51 : vector<2x128xf32>
    %cst_27 = arith.constant 5.000000e-01 : f32
    %54 = vector.broadcast %cst_27 : f32 to vector<2x128xf32>
    %55 = arith.addf %53, %54 : vector<2x128xf32>
    %56 = arith.select %21, %51, %55 : vector<2x128xi1>, vector<2x128xf32>
    %57 = vector.extract_strided_slice %56 {offsets = [0, 0], sizes = [2, 32], strides = [1, 1]} : vector<2x128xf32> to vector<2x32xf32>
    %58 = vector.extract_strided_slice %56 {offsets = [0, 32], sizes = [2, 32], strides = [1, 1]} : vector<2x128xf32> to vector<2x32xf32>
    %59 = vector.extract_strided_slice %56 {offsets = [0, 64], sizes = [2, 32], strides = [1, 1]} : vector<2x128xf32> to vector<2x32xf32>
    %60 = vector.extract_strided_slice %56 {offsets = [0, 96], sizes = [2, 32], strides = [1, 1]} : vector<2x128xf32> to vector<2x32xf32>
    %61 = arith.mulf %58, %42 : vector<2x32xf32>
    %62 = arith.mulf %57, %59 : vector<2x32xf32>
    %63 = arith.addf %61, %62 : vector<2x32xf32>
    %64 = math.tanh %63 : vector<2x32xf32>
    %65 = arith.mulf %60, %64 : vector<2x32xf32>
    %c4 = arith.constant 4 : index
    %c0_28 = arith.constant 0 : index
    %66 = vector.load %arg9[%c4, %c0_28] : memref<16x128xf32, #tpu.memory_space<vmem>>, vector<2x128xf32>
    %cst_29 = arith.constant dense<0.000000e+00> : vector<2x128xf32>
    %67 = tpu.matmul %65, %15, %cst_29 {dimension_numbers = #tpu.dot_dimension_numbers<[1], [0], [0], [1], [0, 0, 1, 1], [], []>} : vector<2x32xf32>, vector<32x128xf32>, vector<2x128xf32> -> vector<2x128xf32>
    %68 = arith.addf %66, %67 : vector<2x128xf32>
    %cst_30 = arith.constant 5.000000e-01 : f32
    %69 = vector.broadcast %cst_30 : f32 to vector<2x128xf32>
    %70 = arith.mulf %69, %68 : vector<2x128xf32>
    %71 = arith.select %21, %68, %70 : vector<2x128xi1>, vector<2x128xf32>
    %72 = math.tanh %71 : vector<2x128xf32>
    %cst_31 = arith.constant 5.000000e-01 : f32
    %73 = vector.broadcast %cst_31 : f32 to vector<2x128xf32>
    %74 = arith.mulf %73, %72 : vector<2x128xf32>
    %cst_32 = arith.constant 5.000000e-01 : f32
    %75 = vector.broadcast %cst_32 : f32 to vector<2x128xf32>
    %76 = arith.addf %74, %75 : vector<2x128xf32>
    %77 = arith.select %21, %72, %76 : vector<2x128xi1>, vector<2x128xf32>
    %78 = vector.extract_strided_slice %77 {offsets = [0, 0], sizes = [2, 32], strides = [1, 1]} : vector<2x128xf32> to vector<2x32xf32>
    %79 = vector.extract_strided_slice %77 {offsets = [0, 32], sizes = [2, 32], strides = [1, 1]} : vector<2x128xf32> to vector<2x32xf32>
    %80 = vector.extract_strided_slice %77 {offsets = [0, 64], sizes = [2, 32], strides = [1, 1]} : vector<2x128xf32> to vector<2x32xf32>
    %81 = vector.extract_strided_slice %77 {offsets = [0, 96], sizes = [2, 32], strides = [1, 1]} : vector<2x128xf32> to vector<2x32xf32>
    %82 = arith.mulf %79, %63 : vector<2x32xf32>
    %83 = arith.mulf %78, %80 : vector<2x32xf32>
    %84 = arith.addf %82, %83 : vector<2x32xf32>
    %85 = math.tanh %84 : vector<2x32xf32>
    %86 = arith.mulf %81, %85 : vector<2x32xf32>
    %c6 = arith.constant 6 : index
    %c0_33 = arith.constant 0 : index
    %87 = vector.load %arg9[%c6, %c0_33] : memref<16x128xf32, #tpu.memory_space<vmem>>, vector<2x128xf32>
    %cst_34 = arith.constant dense<0.000000e+00> : vector<2x128xf32>
    %88 = tpu.matmul %86, %15, %cst_34 {dimension_numbers = #tpu.dot_dimension_numbers<[1], [0], [0], [1], [0, 0, 1, 1], [], []>} : vector<2x32xf32>, vector<32x128xf32>, vector<2x128xf32> -> vector<2x128xf32>
    %89 = arith.addf %87, %88 : vector<2x128xf32>
    %cst_35 = arith.constant 5.000000e-01 : f32
    %90 = vector.broadcast %cst_35 : f32 to vector<2x128xf32>
    %91 = arith.mulf %90, %89 : vector<2x128xf32>
    %92 = arith.select %21, %89, %91 : vector<2x128xi1>, vector<2x128xf32>
    %93 = math.tanh %92 : vector<2x128xf32>
    %cst_36 = arith.constant 5.000000e-01 : f32
    %94 = vector.broadcast %cst_36 : f32 to vector<2x128xf32>
    %95 = arith.mulf %94, %93 : vector<2x128xf32>
    %cst_37 = arith.constant 5.000000e-01 : f32
    %96 = vector.broadcast %cst_37 : f32 to vector<2x128xf32>
    %97 = arith.addf %95, %96 : vector<2x128xf32>
    %98 = arith.select %21, %93, %97 : vector<2x128xi1>, vector<2x128xf32>
    %99 = vector.extract_strided_slice %98 {offsets = [0, 0], sizes = [2, 32], strides = [1, 1]} : vector<2x128xf32> to vector<2x32xf32>
    %100 = vector.extract_strided_slice %98 {offsets = [0, 32], sizes = [2, 32], strides = [1, 1]} : vector<2x128xf32> to vector<2x32xf32>
    %101 = vector.extract_strided_slice %98 {offsets = [0, 64], sizes = [2, 32], strides = [1, 1]} : vector<2x128xf32> to vector<2x32xf32>
    %102 = vector.extract_strided_slice %98 {offsets = [0, 96], sizes = [2, 32], strides = [1, 1]} : vector<2x128xf32> to vector<2x32xf32>
    %103 = arith.mulf %100, %84 : vector<2x32xf32>
    %104 = arith.mulf %99, %101 : vector<2x32xf32>
    %105 = arith.addf %103, %104 : vector<2x32xf32>
    %106 = math.tanh %105 : vector<2x32xf32>
    %107 = arith.mulf %102, %106 : vector<2x32xf32>
    %c8 = arith.constant 8 : index
    %c0_38 = arith.constant 0 : index
    %108 = vector.load %arg9[%c8, %c0_38] : memref<16x128xf32, #tpu.memory_space<vmem>>, vector<2x128xf32>
    %cst_39 = arith.constant dense<0.000000e+00> : vector<2x128xf32>
    %109 = tpu.matmul %107, %15, %cst_39 {dimension_numbers = #tpu.dot_dimension_numbers<[1], [0], [0], [1], [0, 0, 1, 1], [], []>} : vector<2x32xf32>, vector<32x128xf32>, vector<2x128xf32> -> vector<2x128xf32>
    %110 = arith.addf %108, %109 : vector<2x128xf32>
    %cst_40 = arith.constant 5.000000e-01 : f32
    %111 = vector.broadcast %cst_40 : f32 to vector<2x128xf32>
    %112 = arith.mulf %111, %110 : vector<2x128xf32>
    %113 = arith.select %21, %110, %112 : vector<2x128xi1>, vector<2x128xf32>
    %114 = math.tanh %113 : vector<2x128xf32>
    %cst_41 = arith.constant 5.000000e-01 : f32
    %115 = vector.broadcast %cst_41 : f32 to vector<2x128xf32>
    %116 = arith.mulf %115, %114 : vector<2x128xf32>
    %cst_42 = arith.constant 5.000000e-01 : f32
    %117 = vector.broadcast %cst_42 : f32 to vector<2x128xf32>
    %118 = arith.addf %116, %117 : vector<2x128xf32>
    %119 = arith.select %21, %114, %118 : vector<2x128xi1>, vector<2x128xf32>
    %120 = vector.extract_strided_slice %119 {offsets = [0, 0], sizes = [2, 32], strides = [1, 1]} : vector<2x128xf32> to vector<2x32xf32>
    %121 = vector.extract_strided_slice %119 {offsets = [0, 32], sizes = [2, 32], strides = [1, 1]} : vector<2x128xf32> to vector<2x32xf32>
    %122 = vector.extract_strided_slice %119 {offsets = [0, 64], sizes = [2, 32], strides = [1, 1]} : vector<2x128xf32> to vector<2x32xf32>
    %123 = vector.extract_strided_slice %119 {offsets = [0, 96], sizes = [2, 32], strides = [1, 1]} : vector<2x128xf32> to vector<2x32xf32>
    %124 = arith.mulf %121, %105 : vector<2x32xf32>
    %125 = arith.mulf %120, %122 : vector<2x32xf32>
    %126 = arith.addf %124, %125 : vector<2x32xf32>
    %127 = math.tanh %126 : vector<2x32xf32>
    %128 = arith.mulf %123, %127 : vector<2x32xf32>
    %c10 = arith.constant 10 : index
    %c0_43 = arith.constant 0 : index
    %129 = vector.load %arg9[%c10, %c0_43] : memref<16x128xf32, #tpu.memory_space<vmem>>, vector<2x128xf32>
    %cst_44 = arith.constant dense<0.000000e+00> : vector<2x128xf32>
    %130 = tpu.matmul %128, %15, %cst_44 {dimension_numbers = #tpu.dot_dimension_numbers<[1], [0], [0], [1], [0, 0, 1, 1], [], []>} : vector<2x32xf32>, vector<32x128xf32>, vector<2x128xf32> -> vector<2x128xf32>
    %131 = arith.addf %129, %130 : vector<2x128xf32>
    %cst_45 = arith.constant 5.000000e-01 : f32
    %132 = vector.broadcast %cst_45 : f32 to vector<2x128xf32>
    %133 = arith.mulf %132, %131 : vector<2x128xf32>
    %134 = arith.select %21, %131, %133 : vector<2x128xi1>, vector<2x128xf32>
    %135 = math.tanh %134 : vector<2x128xf32>
    %cst_46 = arith.constant 5.000000e-01 : f32
    %136 = vector.broadcast %cst_46 : f32 to vector<2x128xf32>
    %137 = arith.mulf %136, %135 : vector<2x128xf32>
    %cst_47 = arith.constant 5.000000e-01 : f32
    %138 = vector.broadcast %cst_47 : f32 to vector<2x128xf32>
    %139 = arith.addf %137, %138 : vector<2x128xf32>
    %140 = arith.select %21, %135, %139 : vector<2x128xi1>, vector<2x128xf32>
    %141 = vector.extract_strided_slice %140 {offsets = [0, 0], sizes = [2, 32], strides = [1, 1]} : vector<2x128xf32> to vector<2x32xf32>
    %142 = vector.extract_strided_slice %140 {offsets = [0, 32], sizes = [2, 32], strides = [1, 1]} : vector<2x128xf32> to vector<2x32xf32>
    %143 = vector.extract_strided_slice %140 {offsets = [0, 64], sizes = [2, 32], strides = [1, 1]} : vector<2x128xf32> to vector<2x32xf32>
    %144 = vector.extract_strided_slice %140 {offsets = [0, 96], sizes = [2, 32], strides = [1, 1]} : vector<2x128xf32> to vector<2x32xf32>
    %145 = arith.mulf %142, %126 : vector<2x32xf32>
    %146 = arith.mulf %141, %143 : vector<2x32xf32>
    %147 = arith.addf %145, %146 : vector<2x32xf32>
    %148 = math.tanh %147 : vector<2x32xf32>
    %149 = arith.mulf %144, %148 : vector<2x32xf32>
    %c12 = arith.constant 12 : index
    %c0_48 = arith.constant 0 : index
    %150 = vector.load %arg9[%c12, %c0_48] : memref<16x128xf32, #tpu.memory_space<vmem>>, vector<2x128xf32>
    %cst_49 = arith.constant dense<0.000000e+00> : vector<2x128xf32>
    %151 = tpu.matmul %149, %15, %cst_49 {dimension_numbers = #tpu.dot_dimension_numbers<[1], [0], [0], [1], [0, 0, 1, 1], [], []>} : vector<2x32xf32>, vector<32x128xf32>, vector<2x128xf32> -> vector<2x128xf32>
    %152 = arith.addf %150, %151 : vector<2x128xf32>
    %cst_50 = arith.constant 5.000000e-01 : f32
    %153 = vector.broadcast %cst_50 : f32 to vector<2x128xf32>
    %154 = arith.mulf %153, %152 : vector<2x128xf32>
    %155 = arith.select %21, %152, %154 : vector<2x128xi1>, vector<2x128xf32>
    %156 = math.tanh %155 : vector<2x128xf32>
    %cst_51 = arith.constant 5.000000e-01 : f32
    %157 = vector.broadcast %cst_51 : f32 to vector<2x128xf32>
    %158 = arith.mulf %157, %156 : vector<2x128xf32>
    %cst_52 = arith.constant 5.000000e-01 : f32
    %159 = vector.broadcast %cst_52 : f32 to vector<2x128xf32>
    %160 = arith.addf %158, %159 : vector<2x128xf32>
    %161 = arith.select %21, %156, %160 : vector<2x128xi1>, vector<2x128xf32>
    %162 = vector.extract_strided_slice %161 {offsets = [0, 0], sizes = [2, 32], strides = [1, 1]} : vector<2x128xf32> to vector<2x32xf32>
    %163 = vector.extract_strided_slice %161 {offsets = [0, 32], sizes = [2, 32], strides = [1, 1]} : vector<2x128xf32> to vector<2x32xf32>
    %164 = vector.extract_strided_slice %161 {offsets = [0, 64], sizes = [2, 32], strides = [1, 1]} : vector<2x128xf32> to vector<2x32xf32>
    %165 = vector.extract_strided_slice %161 {offsets = [0, 96], sizes = [2, 32], strides = [1, 1]} : vector<2x128xf32> to vector<2x32xf32>
    %166 = arith.mulf %163, %147 : vector<2x32xf32>
    %167 = arith.mulf %162, %164 : vector<2x32xf32>
    %168 = arith.addf %166, %167 : vector<2x32xf32>
    %169 = math.tanh %168 : vector<2x32xf32>
    %170 = arith.mulf %165, %169 : vector<2x32xf32>
    %c14 = arith.constant 14 : index
    %c0_53 = arith.constant 0 : index
    %171 = vector.load %arg9[%c14, %c0_53] : memref<16x128xf32, #tpu.memory_space<vmem>>, vector<2x128xf32>
    %cst_54 = arith.constant dense<0.000000e+00> : vector<2x128xf32>
    %172 = tpu.matmul %170, %15, %cst_54 {dimension_numbers = #tpu.dot_dimension_numbers<[1], [0], [0], [1], [0, 0, 1, 1], [], []>} : vector<2x32xf32>, vector<32x128xf32>, vector<2x128xf32> -> vector<2x128xf32>
    %173 = arith.addf %171, %172 : vector<2x128xf32>
    %cst_55 = arith.constant 5.000000e-01 : f32
    %174 = vector.broadcast %cst_55 : f32 to vector<2x128xf32>
    %175 = arith.mulf %174, %173 : vector<2x128xf32>
    %176 = arith.select %21, %173, %175 : vector<2x128xi1>, vector<2x128xf32>
    %177 = math.tanh %176 : vector<2x128xf32>
    %cst_56 = arith.constant 5.000000e-01 : f32
    %178 = vector.broadcast %cst_56 : f32 to vector<2x128xf32>
    %179 = arith.mulf %178, %177 : vector<2x128xf32>
    %cst_57 = arith.constant 5.000000e-01 : f32
    %180 = vector.broadcast %cst_57 : f32 to vector<2x128xf32>
    %181 = arith.addf %179, %180 : vector<2x128xf32>
    %182 = arith.select %21, %177, %181 : vector<2x128xi1>, vector<2x128xf32>
    %183 = vector.extract_strided_slice %182 {offsets = [0, 0], sizes = [2, 32], strides = [1, 1]} : vector<2x128xf32> to vector<2x32xf32>
    %184 = vector.extract_strided_slice %182 {offsets = [0, 32], sizes = [2, 32], strides = [1, 1]} : vector<2x128xf32> to vector<2x32xf32>
    %185 = vector.extract_strided_slice %182 {offsets = [0, 64], sizes = [2, 32], strides = [1, 1]} : vector<2x128xf32> to vector<2x32xf32>
    %186 = vector.extract_strided_slice %182 {offsets = [0, 96], sizes = [2, 32], strides = [1, 1]} : vector<2x128xf32> to vector<2x32xf32>
    %187 = arith.mulf %184, %168 : vector<2x32xf32>
    %188 = arith.mulf %183, %185 : vector<2x32xf32>
    %189 = arith.addf %187, %188 : vector<2x32xf32>
    %190 = math.tanh %189 : vector<2x32xf32>
    %191 = arith.mulf %186, %190 : vector<2x32xf32>
    %c0_58 = arith.constant 0 : index
    %c0_59 = arith.constant 0 : index
    %192 = vector.load %arg6[%c0_58, %c0_59] : memref<32x128xf32, #tpu.memory_space<vmem>>, vector<32x128xf32>
    %cst_60 = arith.constant dense<0.000000e+00> : vector<2x128xf32>
    %193 = tpu.matmul %191, %192, %cst_60 {dimension_numbers = #tpu.dot_dimension_numbers<[1], [0], [0], [1], [0, 0, 1, 1], [], []>} : vector<2x32xf32>, vector<32x128xf32>, vector<2x128xf32> -> vector<2x128xf32>
    %c0_61 = arith.constant 0 : index
    %c0_62 = arith.constant 0 : index
    %194 = vector.load %arg7[%c0_61, %c0_62] : memref<1x128xf32, #tpu.memory_space<vmem>>, vector<1x128xf32>
    %195 = vector.broadcast %194 : vector<1x128xf32> to vector<2x128xf32>
    %196 = arith.addf %193, %195 : vector<2x128xf32>
    %c0_63 = arith.constant 0 : index
    %c0_64 = arith.constant 0 : index
    %197 = vector.load %arg8[%c0_63, %c0_64] : memref<2x128xf32, #tpu.memory_space<vmem>>, vector<2x128xf32>
    tpu.vector_store %arg8[%c0_63, %c0_64], %196 {strides = array<i32>} : memref<2x128xf32, #tpu.memory_space<vmem>>, vector<2x128xf32>,
    return
  }
  func.func @transform_0(%arg0: i32) -> (i32, i32, i32) {
    %c0_i32 = arith.constant 0 : i32
    %c0_i32_0 = arith.constant 0 : i32
    %c0_i32_1 = arith.constant 0 : i32
    return %c0_i32, %arg0, %c0_i32_0 : i32, i32, i32
  }
  func.func @transform_1(%arg0: i32) -> (i32, i32) {
    %c0_i32 = arith.constant 0 : i32
    %c0_i32_0 = arith.constant 0 : i32
    %c0_i32_1 = arith.constant 0 : i32
    return %c0_i32, %c0_i32_0 : i32, i32
  }
  func.func @transform_2(%arg0: i32) -> (i32, i32) {
    %c0_i32 = arith.constant 0 : i32
    %c0_i32_0 = arith.constant 0 : i32
    %c0_i32_1 = arith.constant 0 : i32
    return %c0_i32, %c0_i32_0 : i32, i32
  }
  func.func @transform_3(%arg0: i32) -> (i32, i32) {
    %c0_i32 = arith.constant 0 : i32
    %c0_i32_0 = arith.constant 0 : i32
    %c0_i32_1 = arith.constant 0 : i32
    return %c0_i32, %c0_i32_0 : i32, i32
  }
  func.func @transform_4(%arg0: i32) -> (i32, i32) {
    %c0_i32 = arith.constant 0 : i32
    %c0_i32_0 = arith.constant 0 : i32
    %c0_i32_1 = arith.constant 0 : i32
    return %c0_i32, %c0_i32_0 : i32, i32
  }
  func.func @transform_5(%arg0: i32) -> (i32, i32) {
    %c0_i32 = arith.constant 0 : i32
    %c0_i32_0 = arith.constant 0 : i32
    %c0_i32_1 = arith.constant 0 : i32
    return %c0_i32, %c0_i32_0 : i32, i32
  }
  func.func @transform_6(%arg0: i32) -> (i32, i32) {
    %c0_i32 = arith.constant 0 : i32
    %c0_i32_0 = arith.constant 0 : i32
    %c0_i32_1 = arith.constant 0 : i32
    return %c0_i32, %c0_i32_0 : i32, i32
  }
  func.func @transform_7(%arg0: i32) -> (i32, i32) {
    %c0_i32 = arith.constant 0 : i32
    %c0_i32_0 = arith.constant 0 : i32
    return %arg0, %c0_i32 : i32, i32
  }
}

</mosaic_0001>

<bundles_post_ra>
// kernel: tpu_custom_call.1
= control target key start
LH: loop header
LB: loop body
LE: loop exit
PB: predicated region body
PF: predicated region fallthrough
CT: control target
= control target key end

     0   :  { %12 = vsyncpa [#allocation4], 0  ;;  %s2109_s0 = inlined_call_operand.hbm [shape: f32[8,2,128], index: 0, kind: input, shape index: {}]   ;;  %s2110_s1 = inlined_call_operand.hbm [shape: f32[128,128], index: 1, kind: input, shape index: {}]   ;;  %s2111_s2 = inlined_call_operand.hbm [shape: f32[128,128], index: 2, kind: input, shape index: {}]   ;;  %s2112_s3 = inlined_call_operand.hbm [shape: f32[32,128], index: 3, kind: input, shape index: {}]   ;;  %s2113_s4 = inlined_call_operand.vmem [shape: f32[1,128], index: 4, kind: input, shape index: {}]   ;;  %s2114_s5 = inlined_call_operand.hbm [shape: f32[32,128], index: 5, kind: input, shape index: {}]   ;;  %s2115_s6 = inlined_call_operand.vmem [shape: f32[1,128], index: 6, kind: input, shape index: {}]   ;;  %s2116_s7 = inlined_call_operand.hbm [shape: f32[2,128], index: 7, kind: output, shape index: {}]  }
   0x1   :  { %13 = vsyncpa [#allocation7], 0 }
   0x2   :  { %14 = vsyncpa [#allocation10], 0 }
   0x3   :  { %15 = vsyncpa [#allocation5], 0  ;;  %s1821_s24 = smov [#allocation6]   ;;  %s1681_s28 = scalar_lea.hbm %s2110_s1, 2048 }
   0x4   :  { %s33_s25 = sshll.u32 %s1821_s24, 4  ;;  %p1682_p0 = scmp.ne.s32.totalorder %s2110_s1, %s1681_s28  ;;  %s34_s25 = int_to_ptr.vmem [resolvable:$true] %s33_s25 }
   0x5   :  { %p1685_p1 = scmp.lt.u32.totalorder %s1681_s28, %s2110_s1 }
   0x7   :  { %p1687_p2 = pnand %p1685_p1, %p1682_p0 }
   0x9   :  { %1690 = shalt.err (!%p1687_p2)
}
   0xa   :  { %s1691_s10 = scalar_lea.vmem %s34_s25, 2048  ;;  %p1696_p4 = scmp.lt.s32.totalorder %s34_s25, %s34_s25 }
   0xb   :  { %p1692_p3 = scmp.ne.s32.totalorder %s34_s25, %s1691_s10  ;;  %p1697_p5 = scmp.lt.s32.totalorder %s1691_s10, %s1691_s10 }
   0xd   :  { %p1698_p6 = por %p1697_p5, %p1696_p4 }
   0xf   :  { %p1699_p7 = pnand %p1698_p6, %p1692_p3 }
  0x11   :  { %1702 = shalt.err (!%p1699_p7)
}
  0x12   :  { %s1822_s11 = smov 128   ;;  %s1823_s12 = smov 8  }
  0x13   :  { %39 = dma.hbm_to_vmem [thread:$0]  %s2110_s1, 2048, %s34_s25, [#allocation7], %s1822_s11, %s1822_s11, %s1823_s12  }
  0x14   :  { %s1824_s15 = smov [#allocation9]   ;;  %s1825_s17 = smov [#allocation3]  }
  0x15   :  { %s57_s16 = sshll.u32 %s1824_s15, 4  ;;  %s21_s18 = sshll.u32 %s1825_s17, 4  ;;  %s58_s16 = int_to_ptr.vmem [resolvable:$true] %s57_s16  ;;  %s22_s18 = int_to_ptr.vmem [resolvable:$true] %s21_s18 }
  0x16   :  { %s1703_s21 = scalar_lea.hbm %s2112_s3, 512 }
  0x17   :  { %p1704_p8 = scmp.ne.s32.totalorder %s2112_s3, %s1703_s21  ;;  %p1707_p9 = scmp.lt.u32.totalorder %s1703_s21, %s2112_s3 }
  0x19   :  { %p1709_p10 = pnand %p1707_p9, %p1704_p8 }
  0x1b   :  { %1712 = shalt.err (!%p1709_p10)
}
  0x1c   :  { %s1713_s1 = scalar_lea.vmem %s58_s16, 512  ;;  %p1718_p12 = scmp.lt.s32.totalorder %s58_s16, %s58_s16 }
  0x1d   :  { %p1714_p11 = scmp.ne.s32.totalorder %s58_s16, %s1713_s1  ;;  %p1719_p13 = scmp.lt.s32.totalorder %s1713_s1, %s1713_s1 }
  0x1f   :  { %p1720_p0 = por %p1719_p13, %p1718_p12 }
  0x21   :  { %p1721_p1 = pnand %p1720_p0, %p1714_p11 }
  0x23   :  { %1724 = shalt.err (!%p1721_p1)
}
  0x24   :  { %63 = dma.hbm_to_vmem [thread:$0]  %s2112_s3, 512, %s58_s16, [#allocation10], %s1822_s11, %s1822_s11, %s1823_s12  }
  0x25   :  { %s1725_s30 = scalar_lea.hbm %s2109_s0, 256 }
  0x26   :  { %p1726_p2 = scmp.ne.s32.totalorder %s2109_s0, %s1725_s30  ;;  %p1729_p3 = scmp.lt.u32.totalorder %s1725_s30, %s2109_s0 }
  0x28   :  { %p1731_p4 = pnand %p1729_p3, %p1726_p2 }
  0x2a   :  { %1734 = shalt.err (!%p1731_p4)
}
  0x2b   :  { %s1735_s14 = scalar_lea.vmem %s22_s18, 256  ;;  %p1740_p6 = scmp.lt.s32.totalorder %s22_s18, %s22_s18 }
  0x2c   :  { %p1736_p5 = scmp.ne.s32.totalorder %s22_s18, %s1735_s14  ;;  %p1741_p7 = scmp.lt.s32.totalorder %s1735_s14, %s1735_s14 }
  0x2e   :  { %p1742_p8 = por %p1741_p7, %p1740_p6 }
  0x30   :  { %p1743_p9 = pnand %p1742_p8, %p1736_p5 }
  0x32   :  { %1746 = shalt.err (!%p1743_p9)
}
  0x33   :  { %s1826_s3 = smov 32   ;;  %s1827_s15 = smov 2  }
  0x34   :  { %27 = dma.hbm_to_vmem [thread:$0]  %s2109_s0, 256, %s22_s18, [#allocation4], %s1826_s3, %s1826_s3, %s1827_s15  }
  0x35   :  { %s1828_s19 = smov [#allocation8]   ;;  %s1829_s21 = smov [#allocation11]  }
  0x36   :  { %s45_s20 = sshll.u32 %s1828_s19, 4  ;;  %s71_s22 = sshll.u32 %s1829_s21, 4  ;;  %s46_s20 = int_to_ptr.vmem [resolvable:$true] %s45_s20  ;;  %s72_s22 = int_to_ptr.vmem [resolvable:$true] %s71_s22 }
  0x37   :  { %s1747_s26 = scalar_lea.hbm %s2111_s2, 2048 }
  0x38   :  { %p1748_p10 = scmp.ne.s32.totalorder %s2111_s2, %s1747_s26  ;;  %p1751_p11 = scmp.lt.u32.totalorder %s1747_s26, %s2111_s2 }
  0x3a   :  { %p1753_p12 = pnand %p1751_p11, %p1748_p10 }
  0x3c   :  { %1756 = shalt.err (!%p1753_p12)
}
  0x3d   :  { %s1757_s0 = scalar_lea.vmem %s46_s20, 2048  ;;  %p1762_p0 = scmp.lt.s32.totalorder %s46_s20, %s46_s20 }
  0x3e   :  { %p1758_p13 = scmp.ne.s32.totalorder %s46_s20, %s1757_s0  ;;  %p1763_p1 = scmp.lt.s32.totalorder %s1757_s0, %s1757_s0 }
  0x40   :  { %p1764_p2 = por %p1763_p1, %p1762_p0 }
  0x42   :  { %p1765_p3 = pnand %p1764_p2, %p1758_p13 }
  0x44   :  { %1768 = shalt.err (!%p1765_p3)
}
  0x45   :  { %51 = dma.hbm_to_vmem [thread:$0]  %s2111_s2, 2048, %s46_s20, [#allocation7], %s1822_s11, %s1822_s11, %s1823_s12  }
  0x46   :  { %s1769_s9 = scalar_lea.hbm %s2114_s5, 512 }
  0x47   :  { %p1770_p4 = scmp.ne.s32.totalorder %s2114_s5, %s1769_s9  ;;  %p1773_p5 = scmp.lt.u32.totalorder %s1769_s9, %s2114_s5 }
  0x49   :  { %p1775_p6 = pnand %p1773_p5, %p1770_p4 }
  0x4b   :  { %1778 = shalt.err (!%p1775_p6)
}
  0x4c   :  { %s1779_s16 = scalar_lea.vmem %s72_s22, 512  ;;  %p1784_p8 = scmp.lt.s32.totalorder %s72_s22, %s72_s22 }
  0x4d   :  { %p1780_p7 = scmp.ne.s32.totalorder %s72_s22, %s1779_s16  ;;  %p1785_p9 = scmp.lt.s32.totalorder %s1779_s16, %s1779_s16 }
  0x4f   :  { %p1786_p10 = por %p1785_p9, %p1784_p8 }
  0x51   :  { %p1787_p11 = pnand %p1786_p10, %p1780_p7 }
  0x53   :  { %1790 = shalt.err (!%p1787_p11)
}
  0x54   :  { %77 = dma.hbm_to_vmem [thread:$0]  %s2114_s5, 512, %s72_s22, [#allocation10], %s1822_s11, %s1822_s11, %s1823_s12  }
  0x55   :  { %1813 = dma.done.wait [#allocation4], 256  }
  0x56   :  { %1814 = vsyncadd [#allocation4], 4294967040 }
  0x57   :  { %1815 = dma.done.wait [#allocation7], 4096  }
  0x58   :  { %1816 = vsyncadd [#allocation7], 4294963200 }
  0x59   :  { %1817 = dma.done.wait [#allocation10], 1024  }
  0x5a   :  { %1818 = vsyncadd [#allocation10], 4294966272  ;;  %v1830_v0 = vmov 1983009808   ;;  %v132_v2 = vlaneseq  ;;  %v103_v3 = vld [vmem:[#allocation6] sm:$0xff]  ;;  %v104_v4 = vld [vmem:[#allocation6 + $0x8] sm:$0xff] }
  0x5b   :  { %v130_v1 = vunpack.c.l.s4 %v1830_v0  ;;  %v105_v5 = vld [vmem:[#allocation6 + $0x10] sm:$0xff]  ;;  %v1516_v8 = vpack.c.bf16 %v104_v4, %v103_v3  ;;  %v106_v9 = vld [vmem:[#allocation6 + $0x18] sm:$0xff]  ;;  %v107_v11 = vld [vmem:[#allocation6 + $0x20] sm:$0xff]  ;;  %vm1832_vm0 = vmmov 0   ;;  %vm354_vm6 = vcmask 261120   ;;  %s1835_s20 = smov [#allocation12]  }
  0x5c   :  { %v133_v7 = vshrl.u32 %v132_v2, 7  ;;  %v1520_v10 = vpack.c.bf16 %v106_v9, %v105_v5  ;;  %v108_v12 = vld [vmem:[#allocation6 + $0x28] sm:$0xff]  ;;  %v109_v15 = vld [vmem:[#allocation6 + $0x30] sm:$0xff]  ;;  %v110_v18 = vld [vmem:[#allocation6 + $0x38] sm:$0xff]  ;;  %s1245_s21 = sshll.u32 %s1835_s20, 4  ;;  %s1246_s21 = int_to_ptr.vmem [resolvable:$true] %s1245_s21 }
  0x5d   :  { %v131_v6 = vunpack.c.0.s8 %v130_v1  ;;  %1517 = vmatprep.subr.bf16.mxu0 %v1516_v8  ;;  %v1524_v14 = vpack.c.bf16 %v108_v12, %v107_v11  ;;  %v95_v16 = vld [vmem:[#allocation3] sm:$0x3]  ;;  %v96_v17 = vld [vmem:[#allocation3 + $0x2] sm:$0x3]  ;;  %v97_v19 = vld [vmem:[#allocation3 + $0x4] sm:$0x3]  ;;  %v1528_v27 = vpack.c.bf16 %v110_v18, %v109_v15  ;;  %p1796_p13 = scmp.lt.s32.totalorder %s1246_s21, %s1246_s21 }
  0x5e   :  { %1519 = vmatpush3.bf16.msra.mxu0 %v1516_v8  ;;  %v98_v20 = vld [vmem:[#allocation3 + $0x6] sm:$0x3]  ;;  %v127_v21 = vcombine.low %v95_v16, %v96_v17  ;;  %v244_v24 = vld [vmem:[#allocation8] sm:$0xff]  ;;  %v245_v25 = vld [vmem:[#allocation8 + $0x8] sm:$0xff]  ;;  %v1831_v12 = vmov 0.0|0.0   ;;  %v1833_v15 = vmov 0.0  }
  0x5f   :  { %v1951_v13 = vsub.s32 %v131_v6, %v133_v7  ;;  %1521 = vmatprep.subr.bf16.mxu0 %v1520_v10  ;;  %v128_v22 = vcombine.low %v97_v19, %v98_v20  ;;  %v246_v26 = vld [vmem:[#allocation8 + $0x10] sm:$0xff]  ;;  %v111_v28 = vld [vmem:[#allocation6 + $0x40] sm:$0xff]  ;;  %v1548_v30 = vpack.c.bf16 %v245_v25, %v244_v24  ;;  %v247_v31 = vld [vmem:[#allocation8 + $0x18] sm:$0xff]  ;;  %s1791_s22 = scalar_lea.vmem %s1246_s21, 32 }
  0x60   :  { %v112_v32 = vld [vmem:[#allocation6 + $0x48] sm:$0xff]  ;;  %v1552_v33 = vpack.c.bf16 %v247_v31, %v246_v26  ;;  %v248_v34 = vld [vmem:[#allocation8 + $0x20] sm:$0xff]  ;;  %v113_v38 = vld [vmem:[#allocation6 + $0x50] sm:$0xff]  ;;  %p1792_p12 = scmp.ne.s32.totalorder %s1246_s21, %s1791_s22  ;;  %p1797_p0 = scmp.lt.s32.totalorder %s1791_s22, %s1791_s22 }
  0x61   :  { %v135_v23 = vrot.slane %v127_v21, %v1951_v13  ;;  %v142_v29 = vrot.slane %v128_v22, %v1951_v13  ;;  %v249_v35 = vld [vmem:[#allocation8 + $0x28] sm:$0xff]  ;;  %1549 = vmatprep.subr.bf16.mxu1 %v1548_v30  ;;  %v1532_v37 = vpack.c.bf16 %v112_v32, %v111_v28  ;;  %v114_v40 = vld [vmem:[#allocation6 + $0x58] sm:$0xff]  ;;  %v250_v41 = vld [vmem:[#allocation8 + $0x30] sm:$0xff] }
  0x62   :  { %1523 = vmatpush3.bf16.msra.mxu0 %v1520_v10  ;;  %1551 = vmatpush3.bf16.msra.mxu1 %v1548_v30  ;;  %v1556_v39 = vpack.c.bf16 %v249_v35, %v248_v34  ;;  %v251_v42 = vld [vmem:[#allocation8 + $0x38] sm:$0xff]  ;;  %v1536_v43 = vpack.c.bf16 %v114_v40, %v113_v38  ;;  %v115_v44 = vld [vmem:[#allocation6 + $0x60] sm:$0xff]  ;;  %v116_v46 = vld [vmem:[#allocation6 + $0x68] sm:$0xff]  ;;  %v349_v30 = vand.u32 127, %v132_v2  ;;  %p1798_p1 = por %p1797_p0, %p1796_p13 }
  0x63   :  { %1525 = vmatprep.subr.bf16.mxu0 %v1524_v14  ;;  %v143_v36 = vcombine.low %v135_v23, %v142_v29  ;;  %1553 = vmatprep.subr.bf16.mxu1 %v1552_v33  ;;  %v1560_v45 = vpack.c.bf16 %v251_v42, %v250_v41  ;;  %v252_v47 = vld [vmem:[#allocation8 + $0x40] sm:$0xff]  ;;  %v253_v48 = vld [vmem:[#allocation8 + $0x48] sm:$0xff]  ;;  %v99_v49 = vld [vmem:[#allocation3 + $0x8] sm:$0x3]  ;;  %v1540_v53 = vpack.c.bf16 %v116_v46, %v115_v44 }
  0x64   :  { %v100_v50 = vld [vmem:[#allocation3 + $0xa] sm:$0x3]  ;;  %v101_v51 = vld [vmem:[#allocation3 + $0xc] sm:$0x3]  ;;  %v102_v52 = vld [vmem:[#allocation3 + $0xe] sm:$0x3]  ;;  %v1564_v55 = vpack.c.bf16 %v253_v48, %v252_v47  ;;  %p1799_p2 = pnand %p1798_p1, %p1792_p12 }
  0x65   :  { %1379 = vmatprep.mubr.f32.mxu0 %v143_v36  ;;  %v117_v54 = vld [vmem:[#allocation6 + $0x70] sm:$0xff]  ;;  %v118_v56 = vld [vmem:[#allocation6 + $0x78] sm:$0xff]  ;;  %v144_v59 = vcombine.low %v99_v49, %v100_v50  ;;  %v145_v60 = vcombine.low %v101_v51, %v102_v52  ;;  %v256_v63 = vld [vmem:[#allocation8 + $0x60] sm:$0xff]  ;;  %vm350_vm3 = vcmp.ge.s32.totalorder %v349_v30, 64  ;;  %vm351_vm4 = vcmp.lt.s32.totalorder %v349_v30, 96 }
  0x66   :  { %1527 = vmatpush3.bf16.msra.mxu0 %v1524_v14  ;;  %1555 = vmatpush3.bf16.msra.mxu1 %v1552_v33  ;;  %v254_v57 = vld [vmem:[#allocation8 + $0x50] sm:$0xff]  ;;  %v255_v58 = vld [vmem:[#allocation8 + $0x58] sm:$0xff]  ;;  %v1544_v61 = vpack.c.bf16 %v118_v56, %v117_v54  ;;  %v257_v0 = vld [vmem:[#allocation8 + $0x68] sm:$0xff] }
  0x67   :  { %1529 = vmatprep.subr.bf16.mxu0 %v1528_v27  ;;  %1557 = vmatprep.subr.bf16.mxu1 %v1556_v39  ;;  %v1568_v62 = vpack.c.bf16 %v255_v58, %v254_v57  ;;  %v152_v1 = vrot.slane %v144_v59, %v1951_v13  ;;  %v159_v3 = vrot.slane %v145_v60, %v1951_v13  ;;  %v258_v6 = vld [vmem:[#allocation8 + $0x70] sm:$0xff]  ;;  %v259_v7 = vld [vmem:[#allocation8 + $0x78] sm:$0xff]  ;;  %v344_v9 = vld [vmem:[#allocation9] sm:$0xff] }
  0x68   :  { %v1572_v4 = vpack.c.bf16 %v257_v0, %v256_v63  ;;  %v1576_v8 = vpack.c.bf16 %v259_v7, %v258_v6  ;;  %v345_v10 = vld [vmem:[#allocation9 + $0x8] sm:$0xff]  ;;  %v346_v11 = vld [vmem:[#allocation9 + $0x10] sm:$0xff]  ;;  %v347_v14 = vld [vmem:[#allocation9 + $0x18] sm:$0xff] }
  0x69   :  { %v160_v5 = vcombine.low %v152_v1, %v159_v3  ;;  %v1958_v13 = vpack.c.bf16 %v345_v10, %v344_v9  ;;  %v1964_v16 = vpack.c.bf16 %v347_v14, %v346_v11  ;;  %v1256_v25 = vld [vmem:[%s2113_s4] ss:$0 sm:$0xff]  ;;  %vm1986_vm5 = vmand %vm350_vm3, %vm351_vm4  ;;  %s1834_s4 = smov 64  }
  0x6a   :  { %1531 = vmatpush3.bf16.msra.mxu0 %v1528_v27  ;;  %1559 = vmatpush3.bf16.msra.mxu1 %v1556_v39 }
  0x6b   :  { %1533 = vmatprep.subr.bf16.mxu0 %v1532_v37  ;;  %1561 = vmatprep.subr.bf16.mxu1 %v1560_v45 }
  0x6e   :  { %1535 = vmatpush3.bf16.msra.mxu0 %v1532_v37  ;;  %1563 = vmatpush3.bf16.msra.mxu1 %v1560_v45 }
  0x6f   :  { %1537 = vmatprep.subr.bf16.mxu0 %v1536_v43  ;;  %1565 = vmatprep.subr.bf16.mxu1 %v1564_v55 }
  0x72   :  { %1539 = vmatpush3.bf16.msra.mxu0 %v1536_v43  ;;  %1567 = vmatpush3.bf16.msra.mxu1 %v1564_v55 }
  0x73   :  { %1541 = vmatprep.subr.bf16.mxu0 %v1540_v53  ;;  %1569 = vmatprep.subr.bf16.mxu1 %v1568_v62 }
  0x76   :  { %1543 = vmatpush3.bf16.msra.mxu0 %v1540_v53  ;;  %1571 = vmatpush3.bf16.msra.mxu1 %v1568_v62 }
  0x77   :  { %1545 = vmatprep.subr.bf16.mxu0 %v1544_v61  ;;  %1573 = vmatprep.subr.bf16.mxu1 %v1572_v4 }
  0x7a   :  { %1547 = vmatpush3.bf16.msra.mxu0 %v1544_v61  ;;  %1575 = vmatpush3.bf16.msra.mxu1 %v1572_v4 }
  0x7b   :  { %1577 = vmatprep.subr.bf16.mxu1 %v1576_v8  ;;  %1580 = vmatprep.subr.bf16.mxu0 %v1831_v12 }
  0x7d   :  { %1380 = vmatmul.mubr.f32.vlgmr.msra.gmra.mrb[0].mxu0 %v160_v5 }
  0x7e   :  { %1579 = vmatpush3.bf16.msra.mxu1 %v1576_v8  ;;  %1425 = vmatprep.mubr.msk.f32.mxu0 %vm1832_vm0, %v1833_v15 }
  0x7f   :  { %1586 = vmatprep.subr.bf16.mxu1 %v1831_v12  ;;  %1582 = vmatpush3.bf16.msra.mxu0 %v1958_v13 }
  0x80   :  { %1583 = vmatprep.subr.bf16.mxu0 %v1831_v12 }
  0x83   :  { %1585 = vmatpush3.bf16.msra.mxu0 %v1964_v16 }
  0x84   :  { %1592 = vmatprep.subr.bf16.mxu0 %v1831_v12 }
  0x86   :  { %1426 = vmatmul.mubr.f32.vlgmr.msra.gmra.mrb[2].mxu0 %v1833_v15 }
  0x87   :  { %1594 = vmatpush3.bf16.msra.mxu0 %v1958_v13  ;;  %1447 = vmatprep.mubr.msk.f32.mxu0 %vm1832_vm0, %v1833_v15 }
  0x88   :  { %1595 = vmatprep.subr.bf16.mxu0 %v1831_v12 }
  0x8b   :  { %1597 = vmatpush3.bf16.msra.mxu0 %v1964_v16 }
  0x8c   :  { %1604 = vmatprep.subr.bf16.mxu0 %v1831_v12 }
 0x150   :  { %v1381_v17 = vpop.f32.mrb[0].mxu0 }
 0x151   :  { %v241_v18 = vmul.f32 0.01, %v1381_v17  ;;  %v229_v19 = vpop.f32.mrb[1].mxu0  ;;  %vm239_vm1 = vcmp.ge.f32.partialorder %v1381_v17, 0.0 }
 0x152   :  { %v240_v20 = vmul.f32 0.01, %v229_v19  ;;  %vm238_vm2 = vcmp.ge.f32.partialorder %v229_v19, 0.0 }
 0x153   :  { %v243_v22 = vsel %vm239_vm1, %v1381_v17, %v241_v18 }
 0x154   :  { %v242_v21 = vsel %vm238_vm2, %v229_v19, %v240_v20 }
 0x155   :  { %1414 = vmatprep.mubr.f32.mxu1 %v242_v21 }
 0x156   :  { %1415 = vmatmul.mubr.f32.vlgmr.msra.gmra.mrb[0].mxu1 %v243_v22 }
 0x157   :  { %1588 = vmatpush3.bf16.msra.mxu1 %v1958_v13  ;;  %1436 = vmatprep.mubr.msk.f32.mxu1 %vm1832_vm0, %v1833_v15 }
 0x158   :  { %1589 = vmatprep.subr.bf16.mxu1 %v1831_v12 }
 0x159   :  { %v424_v23 = vpop.f32.mrb[2].mxu0 }
 0x15a   :  { %v1427_v24 = vpop.f32.mrb[3].mxu0 }
 0x15b   :  { %1591 = vmatpush3.bf16.msra.mxu1 %v1964_v16 }
 0x15c   :  { %1598 = vmatprep.subr.bf16.mxu1 %v1831_v12 }
 0x229   :  { %v1416_v26 = vpop.f32.mrb[0].mxu1 }
 0x22a   :  { %v339_v27 = vadd.f32 %v1416_v26, %v1256_v25  ;;  %v333_v28 = vpop.f32.mrb[1].mxu1 }
 0x22b   :  { %v334_v29 = vadd.f32 %v1256_v25, %v333_v28 }
 0x22c   :  { %343 = vst [vmem:[#allocation2 + $0x8] sm:$0xff] %v339_v27 }
 0x22d   :  { %342 = vst [vmem:[#allocation2] sm:$0xff] %v334_v29 }
 0x234   :  { %v353_v31 = vld [vmem:[#allocation2] sm:$0x3]  ;;  %v452_v48 = vld [vmem:[#allocation2 + $0x2] sm:$0x3]  ;;  %v552_v4 = vld [vmem:[#allocation2 + $0x4] sm:$0x3] }
 0x235   :  { %v428_v32 = vadd.f32 %v424_v23, %v353_v31  ;;  %v652_v27 = vld [vmem:[#allocation2 + $0x6] sm:$0x3] }
 0x237   :  { %v429_v34 = vmul.f32 0.5, %v428_v32 }
 0x239   :  { %v430_v35 = vsel %vm1986_vm5, %v428_v32, %v429_v34 }
 0x23a   :  { %1649 = vtanh.f32 %v430_v35 }
 0x244   :  { %v1650_v36 = vpop.eup %1649 }
 0x245   :  { %v432_v37 = vmul.f32 0.5, %v1650_v36 }
 0x247   :  { %v433_v38 = vadd.f32 0.5, %v432_v37 }
 0x249   :  { %v434_v39 = vsel %vm1986_vm5, %v1650_v36, %v433_v38 }
 0x24a   :  { %437 = vrot.lane.b32.xlu0 %v434_v39, %s1834_s4  ;;  %v435_v41 = vmul.f32 0.0, %v434_v39 }
 0x2bc   :  { %v438_v2 = vpop.permute.xlu0 %437 }
 0x2bd   :  { %v440_v40 = vmul.f32 %v438_v2, %v434_v39 }
 0x2bf   :  { %442 = vrot.lane.b32.xlu0 %v440_v40, %s1826_s3 }
 0x331   :  { %v443_v42 = vpop.permute.xlu0 %442 }
 0x332   :  { %v445_v43 = vadd.f32 %v443_v42, %v435_v41 }
 0x334   :  { %1651 = vtanh.f32 %v445_v43 }
 0x33e   :  { %v1652_v44 = vpop.eup %1651 }
 0x33f   :  { %448 = vrot.lane.b32.xlu1 %v1652_v44, %s1834_s4 }
 0x3b1   :  { %v449_v45 = vpop.permute.xlu1 %448 }
 0x3b2   :  { %v451_v46 = vmul.f32 %v449_v45, %v434_v39 }
 0x3b4   :  { %454 = vrot.lane.b32.xlu1 %v451_v46, %s1826_s3  ;;  %v752_v46 = vld [vmem:[#allocation2 + $0x8] sm:$0x3] }
 0x426   :  { %v455_v47 = vpop.permute.xlu1 %454 }
 0x427   :  { %1437 = vmatmul.mubr.msk.f32.vlgmr.msra.gmra.mrb[2].mxu1 %vm354_vm6, %v455_v47 }
 0x428   :  { %1600 = vmatpush3.bf16.msra.mxu1 %v1958_v13  ;;  %1458 = vmatprep.mubr.msk.f32.mxu1 %vm1832_vm0, %v1833_v15 }
 0x429   :  { %1601 = vmatprep.subr.bf16.mxu1 %v1831_v12 }
 0x42c   :  { %1603 = vmatpush3.bf16.msra.mxu1 %v1964_v16 }
 0x42d   :  { %1610 = vmatprep.subr.bf16.mxu1 %v1831_v12 }
 0x4fa   :  { %v524_v49 = vpop.f32.mrb[2].mxu1 }
 0x4fb   :  { %v528_v50 = vadd.f32 %v524_v49, %v452_v48  ;;  %v1438_v51 = vpop.f32.mrb[3].mxu1 }
 0x4fd   :  { %v529_v52 = vmul.f32 0.5, %v528_v50 }
 0x4ff   :  { %v530_v53 = vsel %vm1986_vm5, %v528_v50, %v529_v52 }
 0x500   :  { %1653 = vtanh.f32 %v530_v53 }
 0x50a   :  { %v1654_v54 = vpop.eup %1653 }
 0x50b   :  { %v532_v55 = vmul.f32 0.5, %v1654_v54 }
 0x50d   :  { %v533_v56 = vadd.f32 0.5, %v532_v55 }
 0x50f   :  { %v534_v57 = vsel %vm1986_vm5, %v1654_v54, %v533_v56 }
 0x510   :  { %537 = vrot.lane.b32.xlu0 %v534_v57, %s1834_s4  ;;  %v535_v60 = vmul.f32 %v534_v57, %v445_v43 }
 0x582   :  { %v538_v58 = vpop.permute.xlu0 %537 }
 0x583   :  { %v540_v59 = vmul.f32 %v538_v58, %v534_v57 }
 0x585   :  { %542 = vrot.lane.b32.xlu1 %v540_v59, %s1826_s3 }
 0x5f7   :  { %v543_v61 = vpop.permute.xlu1 %542 }
 0x5f8   :  { %v545_v62 = vadd.f32 %v543_v61, %v535_v60 }
 0x5fa   :  { %1655 = vtanh.f32 %v545_v62 }
 0x604   :  { %v1656_v63 = vpop.eup %1655 }
 0x605   :  { %548 = vrot.lane.b32.xlu0 %v1656_v63, %s1834_s4 }
 0x677   :  { %v549_v0 = vpop.permute.xlu0 %548 }
 0x678   :  { %v551_v1 = vmul.f32 %v549_v0, %v534_v57 }
 0x67a   :  { %554 = vrot.lane.b32.xlu1 %v551_v1, %s1826_s3  ;;  %v852_v1 = vld [vmem:[#allocation2 + $0xa] sm:$0x3] }
 0x6ec   :  { %v555_v3 = vpop.permute.xlu1 %554 }
 0x6ed   :  { %1448 = vmatmul.mubr.msk.f32.vlgmr.msra.gmra.mrb[4].mxu0 %vm354_vm6, %v555_v3 }
 0x6ee   :  { %1606 = vmatpush3.bf16.msra.mxu0 %v1958_v13  ;;  %1469 = vmatprep.mubr.msk.f32.mxu0 %vm1832_vm0, %v1833_v15 }
 0x6ef   :  { %1607 = vmatprep.subr.bf16.mxu0 %v1831_v12 }
 0x6f2   :  { %1609 = vmatpush3.bf16.msra.mxu0 %v1964_v16 }
 0x6f3   :  { %1616 = vmatprep.subr.bf16.mxu0 %v1831_v12 }
 0x7c0   :  { %v624_v5 = vpop.f32.mrb[4].mxu0 }
 0x7c1   :  { %v628_v6 = vadd.f32 %v624_v5, %v552_v4  ;;  %v1449_v7 = vpop.f32.mrb[5].mxu0 }
 0x7c3   :  { %v629_v8 = vmul.f32 0.5, %v628_v6 }
 0x7c5   :  { %v630_v9 = vsel %vm1986_vm5, %v628_v6, %v629_v8 }
 0x7c6   :  { %1657 = vtanh.f32 %v630_v9 }
 0x7d0   :  { %v1658_v10 = vpop.eup %1657 }
 0x7d1   :  { %v632_v11 = vmul.f32 0.5, %v1658_v10 }
 0x7d3   :  { %v633_v14 = vadd.f32 0.5, %v632_v11 }
 0x7d5   :  { %v634_v17 = vsel %vm1986_vm5, %v1658_v10, %v633_v14 }
 0x7d6   :  { %637 = vrot.lane.b32.xlu0 %v634_v17, %s1834_s4  ;;  %v635_v20 = vmul.f32 %v634_v17, %v545_v62 }
 0x848   :  { %v638_v18 = vpop.permute.xlu0 %637 }
 0x849   :  { %v640_v19 = vmul.f32 %v638_v18, %v634_v17 }
 0x84b   :  { %642 = vrot.lane.b32.xlu1 %v640_v19, %s1826_s3 }
 0x8bd   :  { %v643_v21 = vpop.permute.xlu1 %642 }
 0x8be   :  { %v645_v22 = vadd.f32 %v643_v21, %v635_v20 }
 0x8c0   :  { %1659 = vtanh.f32 %v645_v22 }
 0x8ca   :  { %v1660_v23 = vpop.eup %1659 }
 0x8cb   :  { %648 = vrot.lane.b32.xlu0 %v1660_v23, %s1834_s4  ;;  %v952_v23 = vld [vmem:[#allocation2 + $0xc] sm:$0x3] }
 0x93d   :  { %v649_v24 = vpop.permute.xlu0 %648 }
 0x93e   :  { %v651_v25 = vmul.f32 %v649_v24, %v634_v17 }
 0x940   :  { %654 = vrot.lane.b32.xlu1 %v651_v25, %s1826_s3 }
 0x9b2   :  { %v655_v26 = vpop.permute.xlu1 %654 }
 0x9b3   :  { %1459 = vmatmul.mubr.msk.f32.vlgmr.msra.gmra.mrb[4].mxu1 %vm354_vm6, %v655_v26 }
 0x9b4   :  { %1612 = vmatpush3.bf16.msra.mxu1 %v1958_v13  ;;  %1480 = vmatprep.mubr.msk.f32.mxu1 %vm1832_vm0, %v1833_v15 }
 0x9b5   :  { %1613 = vmatprep.subr.bf16.mxu1 %v1831_v12 }
 0x9b8   :  { %1615 = vmatpush3.bf16.msra.mxu1 %v1964_v16 }
 0x9b9   :  { %1622 = vmatprep.subr.bf16.mxu1 %v1831_v12 }
 0xa86   :  { %v724_v28 = vpop.f32.mrb[4].mxu1 }
 0xa87   :  { %v728_v29 = vadd.f32 %v724_v28, %v652_v27  ;;  %v1460_v30 = vpop.f32.mrb[5].mxu1 }
 0xa89   :  { %v729_v31 = vmul.f32 0.5, %v728_v29 }
 0xa8b   :  { %v730_v32 = vsel %vm1986_vm5, %v728_v29, %v729_v31 }
 0xa8c   :  { %1661 = vtanh.f32 %v730_v32 }
 0xa96   :  { %v1662_v34 = vpop.eup %1661 }
 0xa97   :  { %v732_v35 = vmul.f32 0.5, %v1662_v34 }
 0xa99   :  { %v733_v36 = vadd.f32 0.5, %v732_v35 }
 0xa9b   :  { %v734_v37 = vsel %vm1986_vm5, %v1662_v34, %v733_v36 }
 0xa9c   :  { %737 = vrot.lane.b32.xlu0 %v734_v37, %s1834_s4  ;;  %v735_v2 = vmul.f32 %v734_v37, %v645_v22 }
 0xb0e   :  { %v738_v38 = vpop.permute.xlu0 %737 }
 0xb0f   :  { %v740_v39 = vmul.f32 %v738_v38, %v734_v37 }
 0xb11   :  { %742 = vrot.lane.b32.xlu1 %v740_v39, %s1826_s3 }
 0xb83   :  { %v743_v40 = vpop.permute.xlu1 %742 }
 0xb84   :  { %v745_v41 = vadd.f32 %v743_v40, %v735_v2 }
 0xb86   :  { %1663 = vtanh.f32 %v745_v41 }
 0xb90   :  { %v1664_v42 = vpop.eup %1663 }
 0xb91   :  { %748 = vrot.lane.b32.xlu0 %v1664_v42, %s1834_s4 }
 0xc03   :  { %v749_v43 = vpop.permute.xlu0 %748 }
 0xc04   :  { %v751_v44 = vmul.f32 %v749_v43, %v734_v37 }
 0xc06   :  { %754 = vrot.lane.b32.xlu1 %v751_v44, %s1826_s3 }
 0xc78   :  { %v755_v45 = vpop.permute.xlu1 %754 }
 0xc79   :  { %1470 = vmatmul.mubr.msk.f32.vlgmr.msra.gmra.mrb[6].mxu0 %vm354_vm6, %v755_v45 }
 0xc7a   :  { %1618 = vmatpush3.bf16.msra.mxu0 %v1958_v13  ;;  %1491 = vmatprep.mubr.msk.f32.mxu0 %vm1832_vm0, %v1833_v15 }
 0xc7b   :  { %1619 = vmatprep.subr.bf16.mxu0 %v1831_v12 }
 0xc7e   :  { %1621 = vmatpush3.bf16.msra.mxu0 %v1964_v16 }
 0xc7f   :  { %1628 = vmatprep.subr.bf16.mxu0 %v1831_v12 }
 0xd4c   :  { %v824_v47 = vpop.f32.mrb[6].mxu0 }
 0xd4d   :  { %v828_v48 = vadd.f32 %v824_v47, %v752_v46  ;;  %v1471_v49 = vpop.f32.mrb[7].mxu0 }
 0xd4f   :  { %v829_v50 = vmul.f32 0.5, %v828_v48 }
 0xd51   :  { %v830_v51 = vsel %vm1986_vm5, %v828_v48, %v829_v50 }
 0xd52   :  { %1665 = vtanh.f32 %v830_v51 }
 0xd5c   :  { %v1666_v52 = vpop.eup %1665 }
 0xd5d   :  { %v832_v53 = vmul.f32 0.5, %v1666_v52 }
 0xd5f   :  { %v833_v54 = vadd.f32 0.5, %v832_v53 }
 0xd61   :  { %v834_v55 = vsel %vm1986_vm5, %v1666_v52, %v833_v54 }
 0xd62   :  { %837 = vrot.lane.b32.xlu0 %v834_v55, %s1834_s4  ;;  %v835_v58 = vmul.f32 %v834_v55, %v745_v41  ;;  %v1052_v41 = vld [vmem:[#allocation2 + $0xe] sm:$0x3] }
 0xdd4   :  { %v838_v56 = vpop.permute.xlu0 %837 }
 0xdd5   :  { %v840_v57 = vmul.f32 %v838_v56, %v834_v55  ;;  %v1152_v56 = vld [vmem:[#allocation11] sm:$0xff] }
 0xdd7   :  { %842 = vrot.lane.b32.xlu1 %v840_v57, %s1826_s3  ;;  %v1153_v57 = vld [vmem:[#allocation11 + $0x8] sm:$0xff] }
 0xe49   :  { %v843_v59 = vpop.permute.xlu1 %842 }
 0xe4a   :  { %v845_v60 = vadd.f32 %v843_v59, %v835_v58  ;;  %v1154_v58 = vld [vmem:[#allocation11 + $0x10] sm:$0xff]  ;;  %v1629_v59 = vpack.c.bf16 %v1153_v57, %v1152_v56 }
 0xe4c   :  { %1667 = vtanh.f32 %v845_v60 }
 0xe56   :  { %v1668_v61 = vpop.eup %1667 }
 0xe57   :  { %848 = vrot.lane.b32.xlu0 %v1668_v61, %s1834_s4 }
 0xec9   :  { %v849_v62 = vpop.permute.xlu0 %848 }
 0xeca   :  { %v851_v63 = vmul.f32 %v849_v62, %v834_v55 }
 0xecc   :  { %854 = vrot.lane.b32.xlu1 %v851_v63, %s1826_s3 }
 0xf3e   :  { %v855_v0 = vpop.permute.xlu1 %854 }
 0xf3f   :  { %1481 = vmatmul.mubr.msk.f32.vlgmr.msra.gmra.mrb[6].mxu1 %vm354_vm6, %v855_v0 }
 0xf40   :  { %1624 = vmatpush3.bf16.msra.mxu1 %v1958_v13  ;;  %1502 = vmatprep.mubr.msk.f32.mxu1 %vm1832_vm0, %v1833_v15 }
 0xf41   :  { %1625 = vmatprep.subr.bf16.mxu1 %v1831_v12 }
 0xf44   :  { %1627 = vmatpush3.bf16.msra.mxu1 %v1964_v16 }
0x1012   :  { %v924_v3 = vpop.f32.mrb[6].mxu1 }
0x1013   :  { %v928_v4 = vadd.f32 %v924_v3, %v852_v1  ;;  %v1482_v5 = vpop.f32.mrb[7].mxu1  ;;  %v1264_v1 = vld [vmem:[%s2115_s6] ss:$0 sm:$0xff] }
0x1015   :  { %v929_v6 = vmul.f32 0.5, %v928_v4 }
0x1017   :  { %v930_v7 = vsel %vm1986_vm5, %v928_v4, %v929_v6 }
0x1018   :  { %1669 = vtanh.f32 %v930_v7 }
0x1022   :  { %v1670_v8 = vpop.eup %1669 }
0x1023   :  { %v932_v9 = vmul.f32 0.5, %v1670_v8 }
0x1025   :  { %v933_v10 = vadd.f32 0.5, %v932_v9 }
0x1027   :  { %v934_v13 = vsel %vm1986_vm5, %v1670_v8, %v933_v10 }
0x1028   :  { %937 = vrot.lane.b32.xlu0 %v934_v13, %s1834_s4  ;;  %v935_v16 = vmul.f32 %v934_v13, %v845_v60  ;;  %v1155_v60 = vld [vmem:[#allocation11 + $0x18] sm:$0xff] }
0x1029   :  { %v1632_v61 = vpack.c.bf16 %v1155_v60, %v1154_v58 }
0x109a   :  { %v938_v11 = vpop.permute.xlu0 %937 }
0x109b   :  { %v940_v14 = vmul.f32 %v938_v11, %v934_v13 }
0x109d   :  { %942 = vrot.lane.b32.xlu1 %v940_v14, %s1826_s3 }
0x110f   :  { %v943_v17 = vpop.permute.xlu1 %942 }
0x1110   :  { %v945_v18 = vadd.f32 %v943_v17, %v935_v16 }
0x1112   :  { %1671 = vtanh.f32 %v945_v18 }
0x111c   :  { %v1672_v19 = vpop.eup %1671 }
0x111d   :  { %948 = vrot.lane.b32.xlu0 %v1672_v19, %s1834_s4 }
0x118f   :  { %v949_v20 = vpop.permute.xlu0 %948 }
0x1190   :  { %v951_v21 = vmul.f32 %v949_v20, %v934_v13 }
0x1192   :  { %954 = vrot.lane.b32.xlu1 %v951_v21, %s1826_s3 }
0x1204   :  { %v955_v22 = vpop.permute.xlu1 %954 }
0x1205   :  { %1492 = vmatmul.mubr.msk.f32.vlgmr.msra.gmra.mrb[8].mxu0 %vm354_vm6, %v955_v22 }
0x1206   :  { %1513 = vmatprep.mubr.msk.f32.mxu0 %vm1832_vm0, %v1833_v15  ;;  %1630 = vmatpush3.bf16.msra.mxu0 %v1629_v59 }
0x1207   :  { %1631 = vmatprep.subr.bf16.mxu0 %v1831_v12 }
0x120a   :  { %1633 = vmatpush3.bf16.msra.mxu0 %v1632_v61 }
0x12d8   :  { %v1024_v24 = vpop.f32.mrb[8].mxu0 }
0x12d9   :  { %v1028_v25 = vadd.f32 %v1024_v24, %v952_v23  ;;  %v1493_v26 = vpop.f32.mrb[9].mxu0 }
0x12db   :  { %v1029_v27 = vmul.f32 0.5, %v1028_v25 }
0x12dd   :  { %v1030_v28 = vsel %vm1986_vm5, %v1028_v25, %v1029_v27 }
0x12de   :  { %1673 = vtanh.f32 %v1030_v28 }
0x12e8   :  { %v1674_v29 = vpop.eup %1673 }
0x12e9   :  { %v1032_v30 = vmul.f32 0.5, %v1674_v29 }
0x12eb   :  { %v1033_v31 = vadd.f32 0.5, %v1032_v30 }
0x12ed   :  { %v1034_v32 = vsel %vm1986_vm5, %v1674_v29, %v1033_v31 }
0x12ee   :  { %1037 = vrot.lane.b32.xlu0 %v1034_v32, %s1834_s4  ;;  %v1035_v15 = vmul.f32 %v1034_v32, %v945_v18 }
0x1360   :  { %v1038_v34 = vpop.permute.xlu0 %1037 }
0x1361   :  { %v1040_v35 = vmul.f32 %v1038_v34, %v1034_v32 }
0x1363   :  { %1042 = vrot.lane.b32.xlu1 %v1040_v35, %s1826_s3 }
0x13d5   :  { %v1043_v36 = vpop.permute.xlu1 %1042 }
0x13d6   :  { %v1045_v37 = vadd.f32 %v1043_v36, %v1035_v15 }
0x13d8   :  { %1675 = vtanh.f32 %v1045_v37 }
0x13e2   :  { %v1676_v38 = vpop.eup %1675 }
0x13e3   :  { %1048 = vrot.lane.b32.xlu0 %v1676_v38, %s1834_s4 }
0x1455   :  { %v1049_v39 = vpop.permute.xlu0 %1048 }
0x1456   :  { %v1051_v2 = vmul.f32 %v1049_v39, %v1034_v32 }
0x1458   :  { %1054 = vrot.lane.b32.xlu1 %v1051_v2, %s1826_s3 }
0x14ca   :  { %v1055_v40 = vpop.permute.xlu1 %1054 }
0x14cb   :  { %1503 = vmatmul.mubr.msk.f32.vlgmr.msra.gmra.mrb[8].mxu1 %vm354_vm6, %v1055_v40 }
0x159e   :  { %v1124_v42 = vpop.f32.mrb[8].mxu1 }
0x159f   :  { %v1128_v43 = vadd.f32 %v1124_v42, %v1052_v41  ;;  %v1504_v44 = vpop.f32.mrb[9].mxu1 }
0x15a1   :  { %v1129_v45 = vmul.f32 0.5, %v1128_v43 }
0x15a3   :  { %v1130_v46 = vsel %vm1986_vm5, %v1128_v43, %v1129_v45 }
0x15a4   :  { %1677 = vtanh.f32 %v1130_v46 }
0x15ae   :  { %v1678_v47 = vpop.eup %1677 }
0x15af   :  { %v1132_v48 = vmul.f32 0.5, %v1678_v47 }
0x15b1   :  { %v1133_v49 = vadd.f32 0.5, %v1132_v48 }
0x15b3   :  { %v1134_v50 = vsel %vm1986_vm5, %v1678_v47, %v1133_v49 }
0x15b4   :  { %1137 = vrot.lane.b32.xlu0 %v1134_v50, %s1834_s4  ;;  %v1135_v53 = vmul.f32 %v1134_v50, %v1045_v37 }
0x1626   :  { %v1138_v51 = vpop.permute.xlu0 %1137 }
0x1627   :  { %v1140_v52 = vmul.f32 %v1138_v51, %v1134_v50 }
0x1629   :  { %1142 = vrot.lane.b32.xlu1 %v1140_v52, %s1826_s3 }
0x169b   :  { %v1143_v54 = vpop.permute.xlu1 %1142 }
0x169c   :  { %v1145_v55 = vadd.f32 %v1143_v54, %v1135_v53 }
0x169e   :  { %1679 = vtanh.f32 %v1145_v55 }
0x16a8   :  { %v1680_v33 = vpop.eup %1679 }
0x16a9   :  { %1148 = vrot.lane.b32.xlu0 %v1680_v33, %s1834_s4 }
0x171b   :  { %v1149_v62 = vpop.permute.xlu0 %1148 }
0x171c   :  { %v1151_v63 = vmul.f32 %v1149_v62, %v1134_v50 }
0x171e   :  { %1164 = vrot.lane.b32.xlu1 %v1151_v63, %s1826_s3 }
0x1790   :  { %v1165_v0 = vpop.permute.xlu1 %1164 }
0x1791   :  { %1514 = vmatmul.mubr.msk.f32.vlgmr.msra.gmra.mrb[10].mxu0 %vm354_vm6, %v1165_v0 }
0x1864   :  { %v1234_v3 = vpop.f32.mrb[10].mxu0 }
0x1865   :  { %v1235_v4 = vadd.f32 %v1264_v1, %v1234_v3  ;;  %v1515_v12 = vpop.f32.mrb[11].mxu0 }
0x1867   :  { %1238 = vst [vmem:[#allocation12] sm:$0x3] %v1235_v4 }
0x1868   :  { %1802 = shalt.err (!%p1799_p2)
}
0x1869   :  { %s1803_s24 = scalar_lea.hbm %s2116_s7, 32 }
0x186a   :  { %p1804_p3 = scmp.ne.s32.totalorder %s2116_s7, %s1803_s24  ;;  %p1807_p4 = scmp.lt.u32.totalorder %s1803_s24, %s2116_s7 }
0x186c   :  { %p1809_p5 = pnand %p1807_p4, %p1804_p3 }
0x186e   :  { %1812 = shalt.err (!%p1809_p5)
}
0x186f   :  { %1248 = dma.vmem_to_hbm [thread:$0]  %s1246_s21, 32, %s2116_s7, [#allocation5]  }
0x1870   :  { %1819 = dma.done.wait [#allocation5], 32  }
0x1871   :  { %1820 = vsyncadd [#allocation5], 4294967264 }
0x1872   :  { %1252 = vsyncpa [#allocation4], 1 }
0x1873   :  { %1253 = vsyncpa [#allocation7], 1 }
0x1874   :  { %1254 = vsyncpa [#allocation10], 1 }
0x1875   :  { %1255 = vsyncpa [#allocation5], 1 }

</bundles_post_ra>
